<compile_context>
chip_gen: v7x
topology: tpu7x:2x2x1
jax: 0.10.0
libtpu: 0.0.40
codegen_flags: <defaults>
</compile_context>

<pallas_src>
import jax
import jax.numpy as jnp
from jax.experimental import pallas as pl
from jax.experimental.pallas import tpu as pltpu  # noqa: F401  (TPU backend assumed)


# ---------------------------------------------------------------------------
# Static branch configuration (mirrors the PyTorch module's live branches).
# ---------------------------------------------------------------------------
_C_IN = 1
_C_OUT = 4
_KH = 5
_KW = 5
_T_TAPS = _C_IN * _KH * _KW   # 25 correlation taps
_T_PAD = 32                   # taps + 1 bias row, padded (MXU contraction K)
_CO_PAD = 8                   # c_out padded 4 -> 8: dense (8,128) output stores


def _round_up(x, m):
    return (x + m - 1) // m * m


def _convt_out_hw(h, w, kh, kw, stride, padding):
    sh, sw = stride
    ph, pw = padding
    return (h - 1) * sh - 2 * ph + kh, (w - 1) * sw - 2 * pw + kw


def _augmented_weight(weight, bias):
    """ConvTranspose2d weight (C_in, C_out, KH, KW) -> forward-correlation
    matrix (CO_PAD, T_PAD) bf16 with the bias folded in as an extra tap col."""
    c_in, c_out, kh, kw = weight.shape
    # w_conv[co, ci, i, j] = weight[ci, co, kh-1-i, kw-1-j]
    w_conv = jnp.flip(jnp.transpose(weight, (1, 0, 2, 3)), axis=(2, 3))
    w_mat = w_conv.reshape(c_out, c_in * kh * kw).astype(jnp.float32)
    w_aug = jnp.concatenate([w_mat, bias.astype(jnp.float32)[:, None]], axis=1)
    w_aug = jnp.pad(w_aug, ((0, _CO_PAD - c_out), (0, _T_PAD - w_aug.shape[1])))
    return w_aug.astype(jnp.bfloat16)


def _im2col_patches(x, kh, kw, stride, padding, p_pad):
    """Dilate + pad the input and im2col it into a lane-dense patch tensor.

    x: (N, C_in, H, W) -> (N, T_PAD, p_pad) bf16.  Row order matches
    _augmented_weight: taps (ci, i, j), then a ones/bias row, then zero pad.
    No batch transpose: the batch dim stays leading (kernel indexes it).
    """
    n, c_in, h, w = x.shape
    sh, sw = stride
    ph, pw = padding
    h_out, w_out = _convt_out_hw(h, w, kh, kw, stride, padding)
    p = h_out * w_out

    # TODO(synk): a polyphase decomposition would skip the ~96% structural
    # zeros of the stride-(5,3) branch, but the surviving tap indices (and so
    # the weight column) depend on the output phase, which breaks the single
    # shared-weight matmul; at these sizes the bf16 dilated im2col (~110 KB)
    # is already DMA-trivial, so it is kept in the fused XLA glue.
    xb = x.astype(jnp.bfloat16)
    h_dil = (h - 1) * sh + 1
    w_dil = (w - 1) * sw + 1
    x_dil = jnp.zeros((n, c_in, h_dil, w_dil), jnp.bfloat16)
    x_dil = x_dil.at[:, :, ::sh, ::sw].set(xb)
    xp = jnp.pad(x_dil, ((0, 0), (0, 0),
                         (kh - 1 - ph, kh - 1 - ph),
                         (kw - 1 - pw, kw - 1 - pw)))

    cols = []
    for ci in range(c_in):
        for i in range(kh):
            for j in range(kw):
                cols.append(xp[:, ci, i:i + h_out, j:j + w_out].reshape(n, p))
    cols.append(jnp.ones((n, p), jnp.bfloat16))                 # bias row
    patches = jnp.stack(cols, axis=1)                           # (N, 26, P)
    return jnp.pad(patches, ((0, 0),
                             (0, _T_PAD - patches.shape[1]),
                             (0, p_pad - p)))                   # (N, T_PAD, P_PAD)


# ---------------------------------------------------------------------------
# Pallas kernel: both ConvTranspose2d branches as MXU matmuls, whole batch in
# VMEM (gridless call), bias folded into the weight matrix.
# ---------------------------------------------------------------------------
def _convt_matmul_kernel(w1_ref, p1_ref, w3_ref, p3_ref, o1_ref, o3_ref):
    w1 = w1_ref[...]
    w3 = w3_ref[...]
    n = p1_ref.shape[0]
    # Tiny static batch loop (unrolled); each iteration is a 2-D MXU matmul
    # per branch with an unmasked lane-dense (CO_PAD, P_PAD) store.  With a
    # single grid step there is no per-step store issue to amortize, so the
    # two branch outputs stay separate refs for clean unpacking.
    for b in range(n):
        o1_ref[b] = jnp.dot(w1, p1_ref[b], preferred_element_type=jnp.float32)
        o3_ref[b] = jnp.dot(w3, p3_ref[b], preferred_element_type=jnp.float32)


def _model_forward(params, x):
    n, _, h, w = x.shape

    # Branch geometries (v1: stride 1, pad 0; v3: stride (5,3), pad 0).
    s1, pad1 = (1, 1), (0, 0)
    s3, pad3 = (5, 3), (0, 0)
    h1, w1o = _convt_out_hw(h, w, _KH, _KW, s1, pad1)
    h3, w3o = _convt_out_hw(h, w, _KH, _KW, s3, pad3)
    np1, np3 = h1 * w1o, h3 * w3o
    p1_pad = _round_up(np1, 128)
    p3_pad = _round_up(np3, 128)

    # Glue (fused into this jit): weight/bias folding + lane-dense bf16 im2col.
    w1_aug = _augmented_weight(params["w1"], params["b1"])
    w3_aug = _augmented_weight(params["w3"], params["b3"])
    patches1 = _im2col_patches(x, _KH, _KW, s1, pad1, p1_pad)
    patches3 = _im2col_patches(x, _KH, _KW, s3, pad3, p3_pad)

    # Gridless call: full arrays live in VMEM (<0.5 MB total at N=2).
    # TODO(synk): for large N, re-introduce a batch grid with multi-batch
    # super-blocks and keep the per-step block under v7x's 32 MiB scoped-VMEM
    # default (or raise vmem_limit_bytes); unnecessary at these sizes.
    o1, o3 = pl.pallas_call(
        _convt_matmul_kernel,
        out_shape=(jax.ShapeDtypeStruct((n, _CO_PAD, p1_pad), jnp.float32),
                   jax.ShapeDtypeStruct((n, _CO_PAD, p3_pad), jnp.float32)),
    )(w1_aug, patches1, w3_aug, patches3)

    # Un-pad: pure slice + reshape, no transpose / relayout.
    v1 = o1[:, :_C_OUT, :np1].reshape(n, _C_OUT, h1, w1o)
    v3 = o3[:, :_C_OUT, :np3].reshape(n, _C_OUT, h3, w3o)

    # TODO(synk): convtranspose_kernel_size (v2) has output height
    #   (10-1)*20 - 2*100 + 20 = 0 and convtranspose_pad (v4) uses nested
    #   padding [[4,4],[14,14]]; torch.nn.ConvTranspose2d rejects both, and
    #   v5 = v1 + v2 + v3 + v4 mixes incompatible shapes, so those branches
    #   (and the sum) are omitted rather than faked.
    return v1, v3


model_forward = jax.jit(_model_forward)


def init_params(key):
    """Deterministic init matching the PyTorch module's parameter shapes."""
    ks = jax.random.split(key, 8)

    def u(k, shape, fan):
        bound = 1.0 / (fan ** 0.5)
        return jax.random.uniform(k, shape, jnp.float32, -bound, bound)

    return {
        # ConvTranspose2d(1, 4, 5, stride=1, padding=0)
        "w1": u(ks[0], (1, 4, 5, 5), 4 * 5 * 5),
        "b1": u(ks[1], (4,), 4 * 5 * 5),
        # ConvTranspose2d(1, 4, [20, 120], stride=[20, 1], padding=[100, 10])
        "w2": u(ks[2], (1, 4, 20, 120), 4 * 20 * 120),
        "b2": u(ks[3], (4,), 4 * 20 * 120),
        # ConvTranspose2d(1, 4, 5, stride=[5, 3], padding=0)
        "w3": u(ks[4], (1, 4, 5, 5), 4 * 5 * 5),
        "b3": u(ks[5], (4,), 4 * 5 * 5),
        # ConvTranspose2d(1, 4, 5, stride=1, padding=[[4, 4], [14, 14]])
        "w4": u(ks[6], (1, 4, 5, 5), 4 * 5 * 5),
        "b4": u(ks[7], (4,), 4 * 5 * 5),
    }


def _ref_conv_transpose(x, weight, bias, stride, padding):
    """XLA reference (dilated conv), used only to validate the Pallas kernel."""
    kh, kw = weight.shape[2], weight.shape[3]
    w_conv = jnp.flip(jnp.transpose(weight, (1, 0, 2, 3)), axis=(2, 3))
    out = jax.lax.conv_general_dilated(
        x.astype(jnp.float32), w_conv,
        window_strides=(1, 1),
        padding=[(kh - 1 - padding[0],) * 2, (kw - 1 - padding[1],) * 2],
        lhs_dilation=stride, rhs_dilation=(1, 1),
        dimension_numbers=("NCHW", "OIHW", "NCHW"))
    return out + bias[None, :, None, None]


if __name__ == "__main__":
    key = jax.random.PRNGKey(0)
    kx, kp = jax.random.split(key)
    # batch=2 to exercise the in-kernel batch handling (module input is (N,1,10,10)).
    x1 = jax.random.normal(kx, (2, 1, 10, 10), jnp.float32)
    params = init_params(kp)

    v1, v3 = jax.block_until_ready(model_forward(params, x1))

    assert v1.shape == (2, 4, 14, 14) and v1.dtype == jnp.float32
    assert v3.shape == (2, 4, 50, 32) and v3.dtype == jnp.float32

    r1 = _ref_conv_transpose(x1, params["w1"], params["b1"], (1, 1), (0, 0))
    r3 = _ref_conv_transpose(x1, params["w3"], params["b3"], (5, 3), (0, 0))
    # Tolerance documents the intentional bf16 operand precision (MXU-native).
    assert jnp.allclose(v1, r1, atol=2e-2, rtol=2e-2)
    assert jnp.allclose(v3, r3, atol=2e-2, rtol=2e-2)

    print("KERNEL_OK")
</pallas_src>

<mosaic_0001>
module attributes {stable_mosaic.version = 11 : i64} {
  func.func @_convt_matmul_kernel(%arg0: memref<8x32xbf16, #tpu.memory_space<vmem>>, %arg1: memref<2x32x256xbf16, #tpu.memory_space<vmem>>, %arg2: memref<8x32xbf16, #tpu.memory_space<vmem>>, %arg3: memref<2x32x1664xbf16, #tpu.memory_space<vmem>>, %arg4: memref<2x8x256xf32, #tpu.memory_space<vmem>>, %arg5: memref<2x8x1664xf32, #tpu.memory_space<vmem>>) attributes {dimension_semantics = [], scalar_prefetch = 0 : i64, scratch_operands = 0 : i64, tpu.core_type = #tpu.core_type<tc>} {
    %c0 = arith.constant 0 : index
    %c0_0 = arith.constant 0 : index
    %0 = vector.load %arg0[%c0, %c0_0] : memref<8x32xbf16, #tpu.memory_space<vmem>>, vector<8x32xbf16>
    %c0_1 = arith.constant 0 : index
    %c0_2 = arith.constant 0 : index
    %1 = vector.load %arg2[%c0_1, %c0_2] : memref<8x32xbf16, #tpu.memory_space<vmem>>, vector<8x32xbf16>
    %c0_3 = arith.constant 0 : index
    %c0_4 = arith.constant 0 : index
    %c0_5 = arith.constant 0 : index
    %2 = vector.load %arg1[%c0_3, %c0_4, %c0_5] : memref<2x32x256xbf16, #tpu.memory_space<vmem>>, vector<1x32x256xbf16>
    %3 = vector.shape_cast %2 : vector<1x32x256xbf16> to vector<32x256xbf16>
    %cst = arith.constant dense<0.000000e+00> : vector<8x256xf32>
    %4 = tpu.matmul %0, %3, %cst {dimension_numbers = #tpu.dot_dimension_numbers<[1], [0], [0], [1], [0, 0, 1, 1], [], []>} : vector<8x32xbf16>, vector<32x256xbf16>, vector<8x256xf32> -> vector<8x256xf32>
    %c0_6 = arith.constant 0 : index
    %c0_7 = arith.constant 0 : index
    %c0_8 = arith.constant 0 : index
    %5 = vector.load %arg4[%c0_6, %c0_7, %c0_8] : memref<2x8x256xf32, #tpu.memory_space<vmem>>, vector<1x8x256xf32>
    %6 = vector.shape_cast %5 : vector<1x8x256xf32> to vector<8x256xf32>
    %7 = vector.shape_cast %4 : vector<8x256xf32> to vector<1x8x256xf32>
    tpu.vector_store %arg4[%c0_6, %c0_7, %c0_8], %7 {strides = array<i32>} : memref<2x8x256xf32, #tpu.memory_space<vmem>>, vector<1x8x256xf32>,
    %c0_9 = arith.constant 0 : index
    %c0_10 = arith.constant 0 : index
    %c0_11 = arith.constant 0 : index
    %8 = vector.load %arg3[%c0_9, %c0_10, %c0_11] : memref<2x32x1664xbf16, #tpu.memory_space<vmem>>, vector<1x32x1664xbf16>
    %9 = vector.shape_cast %8 : vector<1x32x1664xbf16> to vector<32x1664xbf16>
    %cst_12 = arith.constant dense<0.000000e+00> : vector<8x1664xf32>
    %10 = tpu.matmul %1, %9, %cst_12 {dimension_numbers = #tpu.dot_dimension_numbers<[1], [0], [0], [1], [0, 0, 1, 1], [], []>} : vector<8x32xbf16>, vector<32x1664xbf16>, vector<8x1664xf32> -> vector<8x1664xf32>
    %c0_13 = arith.constant 0 : index
    %c0_14 = arith.constant 0 : index
    %c0_15 = arith.constant 0 : index
    %11 = vector.load %arg5[%c0_13, %c0_14, %c0_15] : memref<2x8x1664xf32, #tpu.memory_space<vmem>>, vector<1x8x1664xf32>
    %12 = vector.shape_cast %11 : vector<1x8x1664xf32> to vector<8x1664xf32>
    %13 = vector.shape_cast %10 : vector<8x1664xf32> to vector<1x8x1664xf32>
    tpu.vector_store %arg5[%c0_13, %c0_14, %c0_15], %13 {strides = array<i32>} : memref<2x8x1664xf32, #tpu.memory_space<vmem>>, vector<1x8x1664xf32>,
    %c1 = arith.constant 1 : index
    %c0_16 = arith.constant 0 : index
    %c0_17 = arith.constant 0 : index
    %14 = vector.load %arg1[%c1, %c0_16, %c0_17] : memref<2x32x256xbf16, #tpu.memory_space<vmem>>, vector<1x32x256xbf16>
    %15 = vector.shape_cast %14 : vector<1x32x256xbf16> to vector<32x256xbf16>
    %cst_18 = arith.constant dense<0.000000e+00> : vector<8x256xf32>
    %16 = tpu.matmul %0, %15, %cst_18 {dimension_numbers = #tpu.dot_dimension_numbers<[1], [0], [0], [1], [0, 0, 1, 1], [], []>} : vector<8x32xbf16>, vector<32x256xbf16>, vector<8x256xf32> -> vector<8x256xf32>
    %c1_19 = arith.constant 1 : index
    %c0_20 = arith.constant 0 : index
    %c0_21 = arith.constant 0 : index
    %17 = vector.load %arg4[%c1_19, %c0_20, %c0_21] : memref<2x8x256xf32, #tpu.memory_space<vmem>>, vector<1x8x256xf32>
    %18 = vector.shape_cast %17 : vector<1x8x256xf32> to vector<8x256xf32>
    %19 = vector.shape_cast %16 : vector<8x256xf32> to vector<1x8x256xf32>
    tpu.vector_store %arg4[%c1_19, %c0_20, %c0_21], %19 {strides = array<i32>} : memref<2x8x256xf32, #tpu.memory_space<vmem>>, vector<1x8x256xf32>,
    %c1_22 = arith.constant 1 : index
    %c0_23 = arith.constant 0 : index
    %c0_24 = arith.constant 0 : index
    %20 = vector.load %arg3[%c1_22, %c0_23, %c0_24] : memref<2x32x1664xbf16, #tpu.memory_space<vmem>>, vector<1x32x1664xbf16>
    %21 = vector.shape_cast %20 : vector<1x32x1664xbf16> to vector<32x1664xbf16>
    %cst_25 = arith.constant dense<0.000000e+00> : vector<8x1664xf32>
    %22 = tpu.matmul %1, %21, %cst_25 {dimension_numbers = #tpu.dot_dimension_numbers<[1], [0], [0], [1], [0, 0, 1, 1], [], []>} : vector<8x32xbf16>, vector<32x1664xbf16>, vector<8x1664xf32> -> vector<8x1664xf32>
    %c1_26 = arith.constant 1 : index
    %c0_27 = arith.constant 0 : index
    %c0_28 = arith.constant 0 : index
    %23 = vector.load %arg5[%c1_26, %c0_27, %c0_28] : memref<2x8x1664xf32, #tpu.memory_space<vmem>>, vector<1x8x1664xf32>
    %24 = vector.shape_cast %23 : vector<1x8x1664xf32> to vector<8x1664xf32>
    %25 = vector.shape_cast %22 : vector<8x1664xf32> to vector<1x8x1664xf32>
    tpu.vector_store %arg5[%c1_26, %c0_27, %c0_28], %25 {strides = array<i32>} : memref<2x8x1664xf32, #tpu.memory_space<vmem>>, vector<1x8x1664xf32>,
    return
  }
}

</mosaic_0001>

<bundles_post_ra>
// kernel: squeeze.26
= control target key start
LH: loop header
LB: loop body
LE: loop exit
PB: predicated region body
PF: predicated region fallthrough
CT: control target
= control target key end

     0   :  { %vm261_vm0 = vcmask 1047556   ;;  %vm339_vm1 = vcmask 1047557   ;;  %vm226_vm2 = vcmask 261120   ;;  %s675_s20 = smov 64   ;;  %s358_s21 = smov 3  ;;  %vm254_vm3 = vcmask 1048320   ;;  %s844_s0 = inlined_call_operand.vmem [shape: bf16[2,1,50,32], index: 0, kind: input, shape index: {}]   ;;  %s845_s1 = inlined_call_operand.vmem [shape: bf16[2,1,1600], index: 1, kind: output, shape index: {}]  }
   0x1   :  { %v651_v0 = vld [vmem:[%s844_s0 + $0x20] sm:$0xff]   ;;  %v652_v1 = vld [vmem:[%s844_s0 + $0x18] sm:$0xff]   ;;  %v653_v2 = vld [vmem:[%s844_s0 + $0x10] sm:$0xff]   ;;  %s676_s22 = smov 32   ;;  %vm293_vm4 = vcmask 785920   ;;  %vm332_vm5 = vcmask 523520  }
   0x2   :  { %v631_v3 = vunpack.c.l.bf16 %v651_v0  ;;  %v635_v4 = vunpack.c.l.bf16 %v652_v1  ;;  %v636_v5 = vunpack.c.h.bf16 %v652_v1  ;;  %v639_v6 = vunpack.c.l.bf16 %v653_v2  ;;  %v654_v7 = vld [vmem:[%s844_s0 + $0x8] sm:$0xff]   ;;  %v646_v8 = vld [vmem:[%s844_s0] sm:$0xff]   ;;  %v649_v9 = vld [vmem:[%s844_s0 + $0x30] sm:$0xff]  }
   0x3   :  { %v640_v10 = vunpack.c.h.bf16 %v653_v2  ;;  %v643_v11 = vunpack.c.l.bf16 %v654_v7  ;;  %v644_v12 = vunpack.c.h.bf16 %v654_v7  ;;  %v647_v13 = vunpack.c.l.bf16 %v646_v8  ;;  %v650_v14 = vld [vmem:[%s844_s0 + $0x28] sm:$0xff]   ;;  %s674_s0 = smov 96  }
   0x4   :  { %100 = vst [vmem:[#allocation1 + $0x40] sm:$0xff] %v631_v3  ;;  %116 = vst [vmem:[#allocation1 + $0x38] sm:$0xff] %v636_v5  ;;  %v648_v15 = vunpack.c.h.bf16 %v646_v8  ;;  %v623_v16 = vunpack.c.l.bf16 %v649_v9  ;;  %v627_v17 = vunpack.c.l.bf16 %v650_v14  ;;  %v628_v18 = vunpack.c.h.bf16 %v650_v14 }
   0x5   :  { %164 = vst [vmem:[#allocation1 + $0x20] sm:$0xff] %v639_v6  ;;  %132 = vst [vmem:[#allocation1 + $0x30] sm:$0xff] %v635_v4  ;;  %v632_v19 = vunpack.c.h.bf16 %v651_v0  ;;  %v624_v20 = vunpack.c.h.bf16 %v649_v9  ;;  %v677_v0 = vmov 0.0  }
   0x6   :  { %148 = vst [vmem:[#allocation1 + $0x28] sm:$0xff] %v640_v10  ;;  %180 = vst [vmem:[#allocation1 + $0x18] sm:$0xff] %v644_v12 }
   0x7   :  { %196 = vst [vmem:[#allocation1 + $0x10] sm:$0xff] %v643_v11  ;;  %224 = vst [vmem:[#allocation1] sm:$0xff] %v647_v13 }
   0x8   :  { %211 = vst [vmem:[#allocation1 + $0x8] sm:$0xff] %v648_v15  ;;  %36 = vst [vmem:[#allocation1 + $0x60] sm:$0xff] %v623_v16 }
   0x9   :  { %52 = vst [vmem:[#allocation1 + $0x58] sm:$0xff] %v628_v18  ;;  %68 = vst [vmem:[#allocation1 + $0x50] sm:$0xff] %v627_v17 }
   0xa   :  { %84 = vst [vmem:[#allocation1 + $0x48] sm:$0xff] %v632_v19  ;;  %20 = vst [vmem:[#allocation1 + $0x68] sm:$0xff] %v624_v20 }
   0xb   :  { %v260_v21 = vld.sshfl [vmem:[#allocation1 + $0x3b] sm:$0xff pattern:$0x840ccccc]   ;;  %v299_v22 = vld.sshfl [vmem:[#allocation1 + $0x3a] sm:$0xff pattern:$0x840ccccc]  }
   0xc   :  { %v338_v36 = vld [vmem:[#allocation1 + $0x25] ss:$4 sm:$0xe0]  }
   0xd   :  { %v258_v23 = vld [vmem:[#allocation1 + $0x23] ss:$4 sm:$0xf]   ;;  %v297_v24 = vld [vmem:[#allocation1 + $0x22] ss:$4 sm:$0xf]  }
   0xe   :  { %v262_v26 = vsel %vm261_vm0, %v260_v21, %v258_v23  ;;  %v301_v28 = vsel %vm261_vm0, %v299_v22, %v297_v24  ;;  %v336_v35 = vld [vmem:[#allocation1 + $0x21] ss:$4 sm:$0x1f]   ;;  %v230_v42 = vld [vmem:[#allocation1 + $0x20] ss:$4 sm:$0x1f]  }
   0xf   :  { %v251_v25 = vld [vmem:[#allocation1 + $0x3] ss:$4 sm:$0xff]   ;;  %v290_v27 = vld [vmem:[#allocation1 + $0x2] ss:$4 sm:$0xff]   ;;  %v329_v39 = vld [vmem:[#allocation1 + $0x1] ss:$4 sm:$0xff]   ;;  %v340_v40 = vsel %vm339_vm1, %v338_v36, %v336_v35 }
  0x10   :  { %v659_v29 = vpack.i.bf16 %v262_v26, %v251_v25  ;;  %v664_v30 = vpack.i.bf16 %v301_v28, %v290_v27  ;;  %v275_v32 = vld.sshfl [vmem:[#allocation1 + $0x5b] sm:$0xff pattern:$0x840ccccc]   ;;  %v314_v34 = vld.sshfl [vmem:[#allocation1 + $0x5a] sm:$0xff pattern:$0x840ccccc]   ;;  %v669_v45 = vpack.i.bf16 %v340_v40, %v329_v39 }
  0x11   :  { %v273_v31 = vld.sshfl [vmem:[#allocation1 + $0x4b] sm:$0xff pattern:$0x8888840c]   ;;  %v312_v33 = vld.sshfl [vmem:[#allocation1 + $0x4a] sm:$0xff pattern:$0x8888840c]  }
  0x12   :  { %660 = vrot.lane.b32.xlu0 %v659_v29, %s674_s0  ;;  %665 = vrot.lane.b32.xlu1 %v664_v30, %s675_s20  ;;  %v277_v37 = vsel %vm261_vm0, %v275_v32, %v273_v31  ;;  %v316_v38 = vsel %vm261_vm0, %v314_v34, %v312_v33  ;;  %v225_v41 = vld [vmem:[#allocation1] ss:$4 sm:$0xff]   ;;  %233 = vst.msk [vmem:[#allocation0 + $0x40] ss:$8 sm:$0xf] %vm226_vm2, %v230_v42  }
  0x13   :  { %227 = vst.msk [vmem:[#allocation0] ss:$8 sm:$0xf] %vm226_vm2, %v225_v41   ;;  %228 = vst.msk [vmem:[#allocation0] ss:$8 sm:$0xf0] %vm226_vm2, %v225_v41  }
  0x14   :  { %v237_v43 = vld [vmem:[#allocation1 + $0x38] ss:$4 sm:$0xff]   ;;  %235 = vst.msk [vmem:[#allocation0 + $0x5c] sm:$0x10] %vm226_vm2, %v230_v42   ;;  %v349_v46 = vld [vmem:[#allocation1 + $0x45] ss:$4 sm:$0xff]  }
  0x15   :  { %240 = vst.msk [vmem:[#allocation0 + $0x68] ss:$8 sm:$0xf] %vm226_vm2, %v237_v43   ;;  %242 = vst.msk [vmem:[#allocation0 + $0x68] ss:$8 sm:$0xf0] %vm226_vm2, %v237_v43  }
  0x16   :  { %v244_v44 = vld [vmem:[#allocation1 + $0x58] ss:$4 sm:$0x1f]   ;;  %278 = vrot.lane.b32.xlu0 %v277_v37, %s674_s0  ;;  %317 = vrot.lane.b32.xlu1 %v316_v38, %s675_s20  ;;  %v359_v47 = vld [vmem:[#allocation1 + $0x65] ss:$4 sm:%s358_s21]  }
  0x17   :  { %247 = vst.msk [vmem:[#allocation0 + $0xa8] ss:$8 sm:$0xf] %vm226_vm2, %v244_v44   ;;  %249 = vst.msk [vmem:[#allocation0 + $0xc4] sm:$0x10] %vm226_vm2, %v244_v44  }
  0x1a   :  { %670 = vrot.lane.b32.xlu0 %v669_v45, %s676_s22  ;;  %350 = vrot.lane.b32.xlu1 %v349_v46, %s676_s22 }
  0x1e   :  { %360 = vrot.lane.b32.xlu0 %v359_v47, %s676_s22 }
  0x84   :  { %v661_v48 = vpop.permute.xlu0 %660  ;;  %v666_v49 = vpop.permute.xlu1 %665 }
  0x85   :  { %v663_v50 = vunpack.i.h.bf16 %v661_v48  ;;  %v662_v51 = vunpack.i.l.bf16 %v661_v48  ;;  %v668_v52 = vunpack.i.h.bf16 %v666_v49  ;;  %v667_v53 = vunpack.i.l.bf16 %v666_v49 }
  0x87   :  { %267 = vst.msk [vmem:[#allocation0 + $0x40] ss:$8 sm:$0xf] %vm254_vm3, %v663_v50   ;;  %255 = vst.msk [vmem:[#allocation0] ss:$8 sm:$0xf] %vm254_vm3, %v662_v51  }
  0x88   :  { %256 = vst.msk [vmem:[#allocation0] ss:$8 sm:$0xf0] %vm254_vm3, %v662_v51   ;;  %269 = vst.msk [vmem:[#allocation0 + $0xe0] ss:$-24 sm:$0x30] %vm254_vm3, %v663_v50   ;;  %v279_v54 = vpop.permute.xlu0 %278   ;;  %v318_v55 = vpop.permute.xlu1 %317  }
  0x89   :  { %271 = vst.msk [vmem:[#allocation0 + $0x40] ss:$8 sm:$0xc0] %vm254_vm3, %v663_v50   ;;  %282 = vst.msk [vmem:[#allocation0 + $0xa0] ss:$-24 sm:$0x3] %vm254_vm3, %v279_v54  }
  0x8a   :  { %294 = vst.msk [vmem:[#allocation0] ss:$8 sm:$0xf] %vm293_vm4, %v667_v53   ;;  %295 = vst.msk [vmem:[#allocation0] ss:$8 sm:$0xf0] %vm293_vm4, %v667_v53  }
  0x8b   :  { %306 = vst.msk [vmem:[#allocation0 + $0x40] ss:$8 sm:$0xf] %vm293_vm4, %v668_v52   ;;  %308 = vst.msk [vmem:[#allocation0 + $0xe0] ss:$-24 sm:$0x30] %vm293_vm4, %v668_v52  }
  0x8c   :  { %310 = vst.msk [vmem:[#allocation0 + $0x40] ss:$8 sm:$0xc0] %vm293_vm4, %v668_v52   ;;  %321 = vst.msk [vmem:[#allocation0 + $0xa0] ss:$-24 sm:$0x3] %vm293_vm4, %v318_v55   ;;  %v671_v56 = vpop.permute.xlu0 %670  ;;  %v351_v57 = vpop.permute.xlu1 %350  }
  0x8d   :  { %284 = vst.msk [vmem:[#allocation0 + $0x80] ss:$8 sm:$0xc] %vm254_vm3, %v279_v54   ;;  %286 = vst.msk [vmem:[#allocation0 + $0x120] ss:$-24 sm:$0x30] %vm254_vm3, %v279_v54   ;;  %v673_v58 = vunpack.i.h.bf16 %v671_v56  ;;  %v672_v59 = vunpack.i.l.bf16 %v671_v56 }
  0x8e   :  { %288 = vst.msk [vmem:[#allocation0 + $0x80] ss:$8 sm:$0xc0] %vm254_vm3, %v279_v54  }
  0x8f   :  { %323 = vst.msk [vmem:[#allocation0 + $0x80] ss:$8 sm:$0xc] %vm293_vm4, %v318_v55   ;;  %325 = vst.msk [vmem:[#allocation0 + $0x120] ss:$-24 sm:$0x30] %vm293_vm4, %v318_v55  }
  0x90   :  { %327 = vst.msk [vmem:[#allocation0 + $0x80] ss:$8 sm:$0xc0] %vm293_vm4, %v318_v55   ;;  %v361_v60 = vpop.permute.xlu0 %360  }
  0x91   :  { %354 = vst.msk [vmem:[#allocation0 + $0x80] ss:$8 sm:$0xf] %vm332_vm5, %v351_v57   ;;  %356 = vst.msk [vmem:[#allocation0 + $0x80] ss:$8 sm:$0xf0] %vm332_vm5, %v351_v57  }
  0x92   :  { %345 = vst.msk [vmem:[#allocation0 + $0x40] ss:$8 sm:$0xf] %vm332_vm5, %v673_v58   ;;  %333 = vst.msk [vmem:[#allocation0] ss:$8 sm:$0xf] %vm332_vm5, %v672_v59  }
  0x93   :  { %334 = vst.msk [vmem:[#allocation0] ss:$8 sm:$0xf0] %vm332_vm5, %v672_v59   ;;  %347 = vst.msk [vmem:[#allocation0 + $0x40] ss:$8 sm:$0xf0] %vm332_vm5, %v673_v58  }
  0x94   :  { %364 = vst.msk [vmem:[#allocation0 + $0xc0] ss:$8 sm:$0x3] %vm332_vm5, %v361_v60  }
  0x98   :  { %v478_v61 = vld [vmem:[#allocation0 + $0x80] sm:$0x3]  ;;  %v485_v62 = vld [vmem:[#allocation0 + $0x88] sm:$0x3]  ;;  %v492_v63 = vld [vmem:[#allocation0 + $0x90] sm:$0x3] }
  0x99   :  { %v479_v1 = vpack.c.bf16 %v677_v0, %v478_v61  ;;  %v486_v2 = vpack.c.bf16 %v677_v0, %v485_v62  ;;  %v493_v3 = vpack.c.bf16 %v677_v0, %v492_v63  ;;  %v499_v4 = vld [vmem:[#allocation0 + $0x98] sm:$0x3]  ;;  %v506_v5 = vld [vmem:[#allocation0 + $0xa0] sm:$0x3]  ;;  %v513_v6 = vld [vmem:[#allocation0 + $0xa8] sm:$0x3] }
  0x9a   :  { %v422_v7 = vld [vmem:[#allocation0 + $0x40] sm:$0x3]  ;;  %v429_v8 = vld [vmem:[#allocation0 + $0x48] sm:$0x3]  ;;  %v436_v9 = vld [vmem:[#allocation0 + $0x50] sm:$0x3]  ;;  %v500_v10 = vpack.c.bf16 %v677_v0, %v499_v4  ;;  %v507_v11 = vpack.c.bf16 %v677_v0, %v506_v5  ;;  %v514_v12 = vpack.c.bf16 %v677_v0, %v513_v6 }
  0x9b   :  { %v423_v13 = vpack.c.bf16 %v677_v0, %v422_v7  ;;  %v430_v14 = vpack.c.bf16 %v677_v0, %v429_v8  ;;  %v437_v15 = vpack.c.bf16 %v677_v0, %v436_v9  ;;  %v443_v16 = vld [vmem:[#allocation0 + $0x58] sm:$0x3]  ;;  %v369_v17 = vld [vmem:[#allocation0] sm:$0x3]  ;;  %v374_v18 = vld [vmem:[#allocation0 + $0x8] sm:$0x3] }
  0x9c   :  { %611 = vst [vmem:[%s845_s1 + $0x10] sm:$0x1] %v479_v1  ;;  %612 = vst [vmem:[%s845_s1 + $0x11] sm:$0x1] %v486_v2  ;;  %v444_v19 = vpack.c.bf16 %v677_v0, %v443_v16  ;;  %v370_v20 = vpack.c.bf16 %v677_v0, %v369_v17  ;;  %v375_v21 = vpack.c.bf16 %v677_v0, %v374_v18  ;;  %v380_v22 = vld [vmem:[#allocation0 + $0x10] sm:$0x3] }
  0x9d   :  { %613 = vst [vmem:[%s845_s1 + $0x12] sm:$0x1] %v493_v3  ;;  %v387_v23 = vld [vmem:[#allocation0 + $0x18] sm:$0x3]  ;;  %v394_v24 = vld [vmem:[#allocation0 + $0x20] sm:$0x3]  ;;  %v381_v25 = vpack.c.bf16 %v677_v0, %v380_v22 }
  0x9e   :  { %614 = vst [vmem:[%s845_s1 + $0x13] sm:$0x1] %v500_v10  ;;  %615 = vst [vmem:[%s845_s1 + $0x14] sm:$0x1] %v507_v11  ;;  %v388_v26 = vpack.c.bf16 %v677_v0, %v387_v23  ;;  %v395_v27 = vpack.c.bf16 %v677_v0, %v394_v24  ;;  %v401_v28 = vld [vmem:[#allocation0 + $0x28] sm:$0x3] }
  0x9f   :  { %616 = vst [vmem:[%s845_s1 + $0x15] sm:$0x1] %v514_v12  ;;  %603 = vst [vmem:[%s845_s1 + $0x8] sm:$0x1] %v423_v13  ;;  %v408_v29 = vld [vmem:[#allocation0 + $0x30] sm:$0x3]  ;;  %v402_v31 = vpack.c.bf16 %v677_v0, %v401_v28 }
  0xa0   :  { %604 = vst [vmem:[%s845_s1 + $0x9] sm:$0x1] %v430_v14  ;;  %605 = vst [vmem:[%s845_s1 + $0xa] sm:$0x1] %v437_v15  ;;  %v415_v30 = vld [vmem:[#allocation0 + $0x38] sm:$0x3]  ;;  %v409_v32 = vpack.c.bf16 %v677_v0, %v408_v29 }
  0xa1   :  { %606 = vst [vmem:[%s845_s1 + $0xb] sm:$0x1] %v444_v19  ;;  %372 = vst [vmem:[%s845_s1] sm:$0x1] %v370_v20  ;;  %v416_v33 = vpack.c.bf16 %v677_v0, %v415_v30  ;;  %v520_v34 = vld [vmem:[#allocation0 + $0xb0] sm:$0x3] }
  0xa2   :  { %596 = vst [vmem:[%s845_s1 + $0x1] sm:$0x1] %v375_v21  ;;  %v527_v35 = vld [vmem:[#allocation0 + $0xb8] sm:$0x3]  ;;  %v450_v36 = vld [vmem:[#allocation0 + $0x60] sm:$0x3]  ;;  %v521_v37 = vpack.c.bf16 %v677_v0, %v520_v34 }
  0xa3   :  { %597 = vst [vmem:[%s845_s1 + $0x2] sm:$0x1] %v381_v25  ;;  %598 = vst [vmem:[%s845_s1 + $0x3] sm:$0x1] %v388_v26  ;;  %v528_v38 = vpack.c.bf16 %v677_v0, %v527_v35  ;;  %v457_v39 = vld [vmem:[#allocation0 + $0x68] sm:$0x3]  ;;  %v451_v42 = vpack.c.bf16 %v677_v0, %v450_v36 }
  0xa4   :  { %599 = vst [vmem:[%s845_s1 + $0x4] sm:$0x1] %v395_v27  ;;  %v464_v40 = vld [vmem:[#allocation0 + $0x70] sm:$0x3]  ;;  %v471_v41 = vld [vmem:[#allocation0 + $0x78] sm:$0x3]  ;;  %v458_v45 = vpack.c.bf16 %v677_v0, %v457_v39 }
  0xa5   :  { %600 = vst [vmem:[%s845_s1 + $0x5] sm:$0x1] %v402_v31  ;;  %601 = vst [vmem:[%s845_s1 + $0x6] sm:$0x1] %v409_v32  ;;  %v534_v43 = vld [vmem:[#allocation0 + $0xc0] sm:$0x3]  ;;  %v465_v46 = vpack.c.bf16 %v677_v0, %v464_v40  ;;  %v472_v47 = vpack.c.bf16 %v677_v0, %v471_v41 }
  0xa6   :  { %602 = vst [vmem:[%s845_s1 + $0x7] sm:$0x1] %v416_v33  ;;  %v541_v44 = vld [vmem:[#allocation0 + $0xc8] sm:$0x3]  ;;  %617 = vst [vmem:[%s845_s1 + $0x16] sm:$0x1] %v521_v37  ;;  %v535_v48 = vpack.c.bf16 %v677_v0, %v534_v43 }
  0xa7   :  { %618 = vst [vmem:[%s845_s1 + $0x17] sm:$0x1] %v528_v38  ;;  %v542_v49 = vpack.c.bf16 %v677_v0, %v541_v44  ;;  %607 = vst [vmem:[%s845_s1 + $0xc] sm:$0x1] %v451_v42 }
  0xa8   :  { %608 = vst [vmem:[%s845_s1 + $0xd] sm:$0x1] %v458_v45  ;;  %609 = vst [vmem:[%s845_s1 + $0xe] sm:$0x1] %v465_v46 }
  0xa9   :  { %610 = vst [vmem:[%s845_s1 + $0xf] sm:$0x1] %v472_v47  ;;  %619 = vst [vmem:[%s845_s1 + $0x18] sm:$0x1] %v535_v48 }
  0xaa   :  { %620 = vst [vmem:[%s845_s1 + $0x19] sm:$0x1] %v542_v49 }

// kernel: squeeze.1
= control target key start
LH: loop header
LB: loop body
LE: loop exit
PB: predicated region body
PF: predicated region fallthrough
CT: control target
= control target key end

     0   :  { %s92_s10 = smov 3  ;;  %s106_s11 = smov 3  ;;  %vm75_vm0 = vcmask 15360   ;;  %vm67_vm1 = vcmask 113664   ;;  %vm79_vm2 = vcmask 97280   ;;  %vm82_vm3 = vcmask 1048560   ;;  %s275_s0 = inlined_call_operand.vmem [shape: bf16[2,14,14], index: 0, kind: input, shape index: {}]   ;;  %s276_s1 = inlined_call_operand.vmem [shape: bf16[2,1,196], index: 1, kind: output, shape index: {}]  }
   0x1   :  { %v218_v0 = vld [vmem:[%s275_s0 + $0x8] sm:$0xff]   ;;  %v215_v1 = vld [vmem:[%s275_s0] sm:$0xff]   ;;  %s85_s0 = smov 3  ;;  %s99_s12 = smov 3  ;;  %vm89_vm4 = vcmask 1032064   ;;  %vm124_vm5 = vcmask 556464  }
   0x2   :  { %v213_v2 = vunpack.c.h.bf16 %v218_v0  ;;  %v217_v3 = vunpack.c.h.bf16 %v215_v1  ;;  %v212_v4 = vunpack.c.l.bf16 %v218_v0  ;;  %v216_v5 = vunpack.c.l.bf16 %v215_v1  ;;  %s233_s13 = smov 112   ;;  %s234_s14 = smov 98  }
   0x3   :  { %s120_s15 = smov 3  ;;  %s113_s16 = smov 3  ;;  %vm96_vm6 = vcmask 917264   ;;  %vm103_vm7 = vcmask 802464   ;;  %vm110_vm8 = vcmask 687664   ;;  %vm139_vm9 = vcmask 441664  }
   0x4   :  { %20 = vst [vmem:[#allocation1 + $0x18] sm:$0xff] %v213_v2  ;;  %51 = vst [vmem:[#allocation1 + $0x8] sm:$0xff] %v217_v3  ;;  %s70_s17 = smov 3  ;;  %s73_s18 = smov 3  ;;  %vm117_vm10 = vcmask 572864   ;;  %vm132_vm11 = vcmask 458064  }
   0x5   :  { %36 = vst [vmem:[#allocation1 + $0x10] sm:$0xff] %v212_v4  ;;  %64 = vst [vmem:[#allocation1] sm:$0xff] %v216_v5  ;;  %s235_s19 = smov 70   ;;  %s236_s20 = smov 84   ;;  %vm147_vm12 = vcmask 343264   ;;  %vm154_vm13 = vcmask 326864  }
   0x6   :  { %s128_s21 = smov 3  ;;  %s65_s22 = smov 3  ;;  %vm162_vm14 = vcmask 228464   ;;  %vm169_vm15 = vcmask 212064   ;;  %v246_v37 = vmov 0.0  }
   0x7   :  { %s237_s23 = smov 54   ;;  %s238_s24 = smov 56  }
   0x8   :  { %s135_s25 = smov 3  ;;  %s143_s26 = smov 3 }
   0x9   :  { %s239_s27 = smov 126   ;;  %s240_s28 = smov 42  }
   0xa   :  { %s150_s29 = smov 3  ;;  %s158_s30 = smov 3 }
   0xb   :  { %v86_v6 = vld [vmem:[#allocation1 + $0x8] ss:$16 sm:%s85_s0]   ;;  %v121_v10 = vld [vmem:[#allocation1 + $0xd] ss:$16 sm:%s120_s15]   ;;  %v71_v12 = vld [vmem:[#allocation1 + $0x9] ss:$16 sm:%s70_s17]  }
   0xc   :  { %v93_v7 = vld [vmem:[#allocation1 + $0x7] ss:$16 sm:%s92_s10]   ;;  %87 = vrot.lane.b32.xlu0 %v86_v6, %s233_s13  ;;  %v107_v8 = vld [vmem:[#allocation1 + $0x5] ss:$16 sm:%s106_s11]   ;;  %v100_v9 = vld [vmem:[#allocation1 + $0x6] ss:$16 sm:%s99_s12]  }
   0xd   :  { %94 = vrot.lane.b32.xlu1 %v93_v7, %s234_s14  ;;  %v114_v11 = vld [vmem:[#allocation1 + $0x4] ss:$16 sm:%s113_s16]   ;;  %v74_v13 = vld [vmem:[#allocation1 + $0x9] ss:$16 sm:%s73_s18]   ;;  %v66_v14 = vld [vmem:[#allocation1] ss:$16 sm:%s65_s22]  }
   0xe   :  { %68 = vst.msk [vmem:[#allocation0] ss:$16 sm:$0x3] %vm67_vm1, %v66_v14   ;;  %v76_v15 = vsel %vm75_vm0, %v74_v13, %v71_v12  ;;  %v129_v16 = vld [vmem:[#allocation1 + $0x3] ss:$16 sm:%s128_s21]   ;;  %s241_s2 = smov 40  }
   0xf   :  { %v136_v17 = vld [vmem:[#allocation1 + $0xc] ss:$16 sm:%s135_s25]   ;;  %v144_v18 = vld [vmem:[#allocation1 + $0x2] ss:$16 sm:%s143_s26]   ;;  %s242_s3 = smov 28   ;;  %s165_s4 = smov 3 }
  0x10   :  { %108 = vrot.lane.b32.xlu0 %v107_v8, %s235_s19  ;;  %v151_v19 = vld [vmem:[#allocation1 + $0xb] ss:$16 sm:%s150_s29]   ;;  %v159_v20 = vld [vmem:[#allocation1 + $0x1] ss:$16 sm:%s158_s30]   ;;  %s243_s5 = smov 26   ;;  %s244_s6 = smov 14  }
  0x11   :  { %101 = vrot.lane.b32.xlu1 %v100_v9, %s236_s20  ;;  %v166_v21 = vld [vmem:[#allocation1 + $0xa] ss:$16 sm:%s165_s4]   ;;  %s245_s7 = smov 12  }
  0x14   :  { %122 = vrot.lane.b32.xlu0 %v121_v10, %s237_s23 }
  0x15   :  { %115 = vrot.lane.b32.xlu1 %v114_v11, %s238_s24 }
  0x18   :  { %77 = vrot.lane.b32.xlu0 %v76_v15, %s239_s27 }
  0x19   :  { %130 = vrot.lane.b32.xlu1 %v129_v16, %s240_s28 }
  0x1c   :  { %137 = vrot.lane.b32.xlu0 %v136_v17, %s241_s2 }
  0x1d   :  { %145 = vrot.lane.b32.xlu1 %v144_v18, %s242_s3 }
  0x20   :  { %152 = vrot.lane.b32.xlu0 %v151_v19, %s243_s5 }
  0x21   :  { %160 = vrot.lane.b32.xlu1 %v159_v20, %s244_s6 }
  0x24   :  { %167 = vrot.lane.b32.xlu0 %v166_v21, %s245_s7 }
  0x7e   :  { %v88_v22 = vpop.permute.xlu0 %87  }
  0x7f   :  { %v95_v23 = vpop.permute.xlu1 %94  }
  0x82   :  { %v109_v24 = vpop.permute.xlu0 %108  }
  0x83   :  { %v102_v25 = vpop.permute.xlu1 %101  }
  0x86   :  { %v123_v26 = vpop.permute.xlu0 %122  }
  0x87   :  { %v116_v27 = vpop.permute.xlu1 %115  }
  0x8a   :  { %v78_v28 = vpop.permute.xlu0 %77  }
  0x8b   :  { %v131_v29 = vpop.permute.xlu1 %130   ;;  %81 = vst.msk [vmem:[#allocation0 + $0x8] ss:$16 sm:$0x3] %vm79_vm2, %v78_v28  }
  0x8c   :  { %83 = vst.msk [vmem:[#allocation0] ss:$16 sm:$0x3] %vm82_vm3, %v78_v28  }
  0x8d   :  { %90 = vst.msk [vmem:[#allocation0] ss:$16 sm:$0x3] %vm89_vm4, %v88_v22  }
  0x8e   :  { %126 = vst.msk [vmem:[#allocation0 + $0x8] ss:$16 sm:$0x3] %vm124_vm5, %v123_v26   ;;  %v138_v30 = vpop.permute.xlu0 %137  }
  0x8f   :  { %97 = vst.msk [vmem:[#allocation0] ss:$16 sm:$0x3] %vm96_vm6, %v95_v23   ;;  %v146_v31 = vpop.permute.xlu1 %145  }
  0x90   :  { %104 = vst.msk [vmem:[#allocation0] ss:$16 sm:$0x3] %vm103_vm7, %v102_v25  }
  0x91   :  { %111 = vst.msk [vmem:[#allocation0] ss:$16 sm:$0x3] %vm110_vm8, %v109_v24  }
  0x92   :  { %141 = vst.msk [vmem:[#allocation0 + $0x8] ss:$16 sm:$0x3] %vm139_vm9, %v138_v30   ;;  %v153_v32 = vpop.permute.xlu0 %152  }
  0x93   :  { %118 = vst.msk [vmem:[#allocation0] ss:$16 sm:$0x3] %vm117_vm10, %v116_v27   ;;  %v161_v33 = vpop.permute.xlu1 %160  }
  0x94   :  { %133 = vst.msk [vmem:[#allocation0] ss:$16 sm:$0x3] %vm132_vm11, %v131_v29  }
  0x95   :  { %148 = vst.msk [vmem:[#allocation0] ss:$16 sm:$0x3] %vm147_vm12, %v146_v31  }
  0x96   :  { %156 = vst.msk [vmem:[#allocation0 + $0x8] ss:$16 sm:$0x3] %vm154_vm13, %v153_v32   ;;  %v168_v34 = vpop.permute.xlu0 %167  }
  0x97   :  { %163 = vst.msk [vmem:[#allocation0] ss:$16 sm:$0x3] %vm162_vm14, %v161_v33  }
  0x98   :  { %171 = vst.msk [vmem:[#allocation0 + $0x8] ss:$16 sm:$0x3] %vm169_vm15, %v168_v34  }
  0x9e   :  { %v176_v35 = vld [vmem:[#allocation0] sm:$0x3]  ;;  %v187_v36 = vld [vmem:[#allocation0 + $0x10] sm:$0x3] }
  0x9f   :  { %v177_v38 = vpack.c.bf16 %v246_v37, %v176_v35  ;;  %v188_v39 = vpack.c.bf16 %v246_v37, %v187_v36  ;;  %v181_v40 = vld [vmem:[#allocation0 + $0x8] sm:$0x3]  ;;  %v194_v41 = vld [vmem:[#allocation0 + $0x18] sm:$0x3] }
  0xa0   :  { %v182_v42 = vpack.c.bf16 %v246_v37, %v181_v40  ;;  %v195_v43 = vpack.c.bf16 %v246_v37, %v194_v41 }
  0xa1   :  { %179 = vst [vmem:[%s276_s1] sm:$0x1] %v177_v38  ;;  %208 = vst [vmem:[%s276_s1 + $0x2] sm:$0x1] %v188_v39 }
  0xa2   :  { %207 = vst [vmem:[%s276_s1 + $0x1] sm:$0x1] %v182_v42  ;;  %209 = vst [vmem:[%s276_s1 + $0x3] sm:$0x1] %v195_v43 }

// kernel: _model_forward.1
= control target key start
LH: loop header
LB: loop body
LE: loop exit
PB: predicated region body
PF: predicated region fallthrough
CT: control target
= control target key end

     0   :  { %v1329_v1 = vmov 0   ;;  %vm46_vm0 = vcmask 261120   ;;  %v1330_v30 = vmov 0.0   ;;  %vm1331_vm1 = vmmov 0   ;;  %s1696_s1 = inlined_call_operand.vmem [shape: bf16[2,32,256], index: 1, kind: input, shape index: {}]   ;;  %s1697_s3 = inlined_call_operand.vmem [shape: bf16[2,32,1664], index: 3, kind: input, shape index: {}]   ;;  %s1698_s0 = inlined_call_operand.vmem [shape: bf16[8,32], index: 0, kind: input, shape index: {}]   ;;  %s1699_s2 = inlined_call_operand.vmem [shape: bf16[8,32], index: 2, kind: input, shape index: {}]   ;;  %s1700_s4 = inlined_call_operand.vmem [shape: f32[2,8,256], index: 4, kind: output, shape index: {0}]   ;;  %s1701_s5 = inlined_call_operand.vmem [shape: f32[2,8,1664], index: 5, kind: output, shape index: {1}]  }
   0x1   :  { %v1241_v0 = vld [vmem:[%s1696_s1 + $0x4] ss:$8 sps:$4 sm:$0xff]   ;;  %82 = vmatprep.mubr.bf16.mxu0 %v1329_v1  ;;  %288 = vmatprep.mubr.bf16.mxu1 %v1329_v1  ;;  %v1245_v3 = vld [vmem:[%s1696_s1] ss:$8 sps:$4 sm:$0xff]   ;;  %v1247_v5 = vld [vmem:[%s1696_s1 + $0x14] ss:$8 sps:$4 sm:$0xff]  }
   0x2   :  { %v1243_v2 = vld [vmem:[%s1697_s3 + $0x4] ss:$52 sps:$4 sm:$0xff]   ;;  %50 = vmatprep.subr.bf16.mxu0 %v1241_v0  ;;  %v1246_v4 = vld [vmem:[%s1697_s3] ss:$52 sps:$4 sm:$0xff]   ;;  %v1252_v8 = vld [vmem:[%s1697_s3 + $0x68] ss:$52 sps:$4 sm:$0xff]  }
   0x3   :  { %256 = vmatprep.subr.bf16.mxu1 %v1243_v2  ;;  %51 = vmatpush1.bf16.msra.mxu0 %v1245_v3  ;;  %v1249_v6 = vld [vmem:[%s1697_s3 + $0x6c] ss:$52 sps:$4 sm:$0xff]   ;;  %v1251_v7 = vld [vmem:[%s1696_s1 + $0x10] ss:$8 sps:$4 sm:$0xff]   ;;  %v1253_v11 = vld [vmem:[%s1697_s3 + $0x8] ss:$52 sps:$4 sm:$0xff]  }
   0x4   :  { %257 = vmatpush1.bf16.msra.mxu1 %v1246_v4  ;;  %52 = vmatprep.subr.bf16.mxu0 %v1247_v5  ;;  %v1391_v9 = vld [vmem:[%s1698_s0] sm:$0xf]  ;;  %v1256_v13 = vld [vmem:[%s1697_s3 + $0x10] ss:$52 sps:$4 sm:$0xff]   ;;  %v1258_v14 = vld [vmem:[%s1697_s3 + $0x14] ss:$52 sps:$4 sm:$0xff]  }
   0x5   :  { %258 = vmatprep.subr.bf16.mxu1 %v1249_v6  ;;  %v1396_v10 = vld [vmem:[%s1699_s2] sm:$0xf]  ;;  %v1261_v15 = vld [vmem:[%s1697_s3 + $0x74] ss:$52 sps:$4 sm:$0xff]   ;;  %v1264_v16 = vld [vmem:[%s1697_s3 + $0x7c] ss:$52 sps:$4 sm:$0xff]  }
   0x6   :  { %v1255_v12 = vld [vmem:[%s1697_s3 + $0xc] ss:$52 sps:$4 sm:$0xff]   ;;  %v1259_v17 = vld [vmem:[%s1697_s3 + $0x70] ss:$52 sps:$4 sm:$0xff]   ;;  %v1274_v26 = vld [vmem:[%s1697_s3 + $0x88] ss:$52 sps:$4 sm:$0xff]  }
   0x7   :  { %53 = vmatpush1.bf16.msra.mxu0 %v1251_v7  ;;  %v1262_v18 = vld [vmem:[%s1697_s3 + $0x78] ss:$52 sps:$4 sm:$0xff]   ;;  %v1267_v19 = vld [vmem:[%s1697_s3 + $0x1c] ss:$52 sps:$4 sm:$0xff]   ;;  %v1268_v22 = vld [vmem:[%s1697_s3 + $0x20] ss:$52 sps:$4 sm:$0xff]  }
   0x8   :  { %259 = vmatpush1.bf16.msra.mxu1 %v1252_v8  ;;  %297 = vmatprep.subr.bf16.mxu0 %v1255_v12  ;;  %v1270_v20 = vld [vmem:[%s1697_s3 + $0x24] ss:$52 sps:$4 sm:$0xff]   ;;  %v1276_v24 = vld [vmem:[%s1697_s3 + $0x8c] ss:$52 sps:$4 sm:$0xff]   ;;  %v1277_v28 = vld [vmem:[%s1697_s3 + $0x28] ss:$52 sps:$4 sm:$0xff]  }
   0x9   :  { %338 = vmatprep.subr.bf16.mxu1 %v1258_v14  ;;  %v1265_v21 = vld [vmem:[%s1697_s3 + $0x18] ss:$52 sps:$4 sm:$0xff]   ;;  %v1271_v25 = vld [vmem:[%s1697_s3 + $0x80] ss:$52 sps:$4 sm:$0xff]   ;;  %v1280_v29 = vld [vmem:[%s1697_s3 + $0x30] ss:$52 sps:$4 sm:$0xff]  }
   0xa   :  { %1097 = vmatmul.mubr.msk.bf16.vlgmr.msra.gmra.mrb[0].mxu0 %vm46_vm0, %v1391_v9  ;;  %v1273_v23 = vld [vmem:[%s1697_s3 + $0x84] ss:$52 sps:$4 sm:$0xff]   ;;  %v1279_v27 = vld [vmem:[%s1697_s3 + $0x2c] ss:$52 sps:$4 sm:$0xff]   ;;  %v1283_v31 = vld [vmem:[%s1697_s3 + $0x94] ss:$52 sps:$4 sm:$0xff]  }
   0xb   :  { %1124 = vmatmul.mubr.msk.bf16.vlgmr.msra.gmra.mrb[0].mxu1 %vm46_vm0, %v1396_v10  ;;  %298 = vmatpush1.bf16.msra.mxu0 %v1253_v11  ;;  %v1281_v32 = vld [vmem:[%s1697_s3 + $0x90] ss:$52 sps:$4 sm:$0xff]   ;;  %v1284_v33 = vld [vmem:[%s1697_s3 + $0x98] ss:$52 sps:$4 sm:$0xff]   ;;  %v1290_v35 = vld [vmem:[%s1697_s3 + $0xd4] ss:$52 sps:$4 sm:$0xff]  }
   0xc   :  { %339 = vmatpush1.bf16.msra.mxu1 %v1256_v13  ;;  %299 = vmatprep.subr.bf16.mxu0 %v1261_v15  ;;  %v1287_v34 = vld [vmem:[%s1696_s1 + $0x24] ss:$8 sps:$4 sm:$0xff]   ;;  %v1285_v36 = vld [vmem:[%s1696_s1 + $0x20] ss:$8 sps:$4 sm:$0xff]   ;;  %v1293_v38 = vld [vmem:[%s1696_s1 + $0x34] ss:$8 sps:$4 sm:$0xff]  }
   0xd   :  { %340 = vmatprep.subr.bf16.mxu1 %v1264_v16  ;;  %329 = vmatprep.mubr.bf16.mxu0 %v1329_v1  ;;  %v1288_v37 = vld [vmem:[%s1697_s3 + $0xd0] ss:$52 sps:$4 sm:$0xff]   ;;  %v1294_v41 = vld [vmem:[%s1697_s3 + $0x138] ss:$52 sps:$4 sm:$0xff]   ;;  %v1300_v45 = vld [vmem:[%s1697_s3 + $0xe0] ss:$52 sps:$4 sm:$0xff]  }
   0xe   :  { %370 = vmatprep.mubr.bf16.mxu1 %v1329_v1  ;;  %v1296_v39 = vld [vmem:[%s1697_s3 + $0x13c] ss:$52 sps:$4 sm:$0xff]   ;;  %v1302_v43 = vld [vmem:[%s1697_s3 + $0xe4] ss:$52 sps:$4 sm:$0xff]   ;;  %v1308_v47 = vld [vmem:[%s1697_s3 + $0x14c] ss:$52 sps:$4 sm:$0xff]  }
   0xf   :  { %300 = vmatpush1.bf16.msra.mxu0 %v1259_v17  ;;  %v1291_v40 = vld [vmem:[%s1696_s1 + $0x30] ss:$8 sps:$4 sm:$0xff]   ;;  %v1303_v48 = vld [vmem:[%s1697_s3 + $0x140] ss:$52 sps:$4 sm:$0xff]   ;;  %v1306_v49 = vld [vmem:[%s1697_s3 + $0x148] ss:$52 sps:$4 sm:$0xff]  }
  0x10   :  { %341 = vmatpush1.bf16.msra.mxu1 %v1262_v18  ;;  %379 = vmatprep.subr.bf16.mxu0 %v1267_v19  ;;  %v1299_v42 = vld [vmem:[%s1697_s3 + $0xdc] ss:$52 sps:$4 sm:$0xff]   ;;  %v1297_v44 = vld [vmem:[%s1697_s3 + $0xd8] ss:$52 sps:$4 sm:$0xff]   ;;  %v1314_v51 = vld [vmem:[%s1697_s3 + $0xf4] ss:$52 sps:$4 sm:$0xff]  }
  0x11   :  { %420 = vmatprep.subr.bf16.mxu1 %v1270_v20  ;;  %v1305_v46 = vld [vmem:[%s1697_s3 + $0x144] ss:$52 sps:$4 sm:$0xff]   ;;  %v1311_v50 = vld [vmem:[%s1697_s3 + $0xec] ss:$52 sps:$4 sm:$0xff]   ;;  %v1309_v52 = vld [vmem:[%s1697_s3 + $0xe8] ss:$52 sps:$4 sm:$0xff]  }
  0x12   :  { %1125 = vmatmul.mubr.msk.bf16.vlgmr.msra.gmra.mrb[4].mxu0 %vm46_vm0, %v1396_v10  ;;  %v1312_v53 = vld [vmem:[%s1697_s3 + $0xf0] ss:$52 sps:$4 sm:$0xff]   ;;  %v1317_v54 = vld [vmem:[%s1697_s3 + $0x154] ss:$52 sps:$4 sm:$0xff]   ;;  %v1318_v57 = vld [vmem:[%s1697_s3 + $0x158] ss:$52 sps:$4 sm:$0xff]  }
  0x13   :  { %1126 = vmatmul.mubr.msk.bf16.vlgmr.msra.gmra.mrb[4].mxu1 %vm46_vm0, %v1396_v10  ;;  %380 = vmatpush1.bf16.msra.mxu0 %v1265_v21  ;;  %v1320_v55 = vld [vmem:[%s1697_s3 + $0x15c] ss:$52 sps:$4 sm:$0xff]   ;;  %v1321_v59 = vld [vmem:[%s1697_s3 + $0xf8] ss:$52 sps:$4 sm:$0xff]   ;;  %v1324_v60 = vld [vmem:[%s1697_s3 + $0x100] ss:$52 sps:$4 sm:$0xff]  }
  0x14   :  { %421 = vmatpush1.bf16.msra.mxu1 %v1268_v22  ;;  %381 = vmatprep.subr.bf16.mxu0 %v1273_v23  ;;  %v1315_v56 = vld [vmem:[%s1697_s3 + $0x150] ss:$52 sps:$4 sm:$0xff]   ;;  %v1325_v62 = vld [vmem:[%s1697_s3 + $0x160] ss:$52 sps:$4 sm:$0xff]   ;;  %v1328_v63 = vld [vmem:[%s1697_s3 + $0x168] ss:$52 sps:$4 sm:$0xff]  }
  0x15   :  { %422 = vmatprep.subr.bf16.mxu1 %v1276_v24  ;;  %411 = vmatprep.mubr.bf16.mxu0 %v1329_v1  ;;  %v1323_v58 = vld [vmem:[%s1697_s3 + $0xfc] ss:$52 sps:$4 sm:$0xff]   ;;  %v1327_v61 = vld [vmem:[%s1697_s3 + $0x164] ss:$52 sps:$4 sm:$0xff]  }
  0x16   :  { %452 = vmatprep.mubr.bf16.mxu1 %v1329_v1 }
  0x17   :  { %382 = vmatpush1.bf16.msra.mxu0 %v1271_v25 }
  0x18   :  { %423 = vmatpush1.bf16.msra.mxu1 %v1274_v26  ;;  %461 = vmatprep.subr.bf16.mxu0 %v1279_v27 }
  0x19   :  { %1222 = vmatprep.subr.bf16.mxu1 %v1330_v30 }
  0x1a   :  { %1127 = vmatmul.mubr.msk.bf16.vlgmr.msra.gmra.mrb[8].mxu0 %vm46_vm0, %v1396_v10 }
  0x1b   :  { %1128 = vmatmul.mubr.msk.bf16.vlgmr.msra.gmra.mrb[8].mxu1 %vm46_vm0, %v1396_v10  ;;  %462 = vmatpush1.bf16.msra.mxu0 %v1277_v28 }
  0x1c   :  { %1223 = vmatpush3.bf16.msra.mxu1 %v1280_v29  ;;  %463 = vmatprep.subr.bf16.mxu0 %v1283_v31 }
  0x1d   :  { %1224 = vmatprep.subr.bf16.mxu1 %v1330_v30  ;;  %493 = vmatprep.mubr.bf16.mxu0 %v1329_v1 }
  0x1e   :  { %1226 = vmatprep.mubr.msk.bf16.mxu1 %vm1331_vm1, %v1330_v30 }
  0x1f   :  { %464 = vmatpush1.bf16.msra.mxu0 %v1281_v32 }
  0x20   :  { %1225 = vmatpush3.bf16.msra.mxu1 %v1284_v33  ;;  %580 = vmatprep.subr.bf16.mxu0 %v1287_v34 }
  0x21   :  { %785 = vmatprep.subr.bf16.mxu1 %v1290_v35 }
  0x22   :  { %1129 = vmatmul.mubr.msk.bf16.vlgmr.msra.gmra.mrb[12].mxu0 %vm46_vm0, %v1396_v10 }
  0x23   :  { %1227 = vmatmul.mubr.msk.bf16.vlgmr.msra.gmra.mrb[12].mxu1 %vm46_vm0, %v1396_v10  ;;  %581 = vmatpush1.bf16.msra.mxu0 %v1285_v36 }
  0x24   :  { %786 = vmatpush1.bf16.msra.mxu1 %v1288_v37  ;;  %582 = vmatprep.subr.bf16.mxu0 %v1293_v38 }
  0x25   :  { %787 = vmatprep.subr.bf16.mxu1 %v1296_v39  ;;  %612 = vmatprep.mubr.bf16.mxu0 %v1329_v1 }
  0x26   :  { %817 = vmatprep.mubr.bf16.mxu1 %v1329_v1 }
  0x27   :  { %583 = vmatpush1.bf16.msra.mxu0 %v1291_v40 }
  0x28   :  { %788 = vmatpush1.bf16.msra.mxu1 %v1294_v41  ;;  %826 = vmatprep.subr.bf16.mxu0 %v1299_v42 }
  0x29   :  { %867 = vmatprep.subr.bf16.mxu1 %v1302_v43 }
  0x2a   :  { %1139 = vmatmul.mubr.msk.bf16.vlgmr.msra.gmra.mrb[16].mxu0 %vm46_vm0, %v1391_v9 }
  0x2b   :  { %1196 = vmatmul.mubr.msk.bf16.vlgmr.msra.gmra.mrb[16].mxu1 %vm46_vm0, %v1396_v10  ;;  %827 = vmatpush1.bf16.msra.mxu0 %v1297_v44 }
  0x2c   :  { %868 = vmatpush1.bf16.msra.mxu1 %v1300_v45  ;;  %828 = vmatprep.subr.bf16.mxu0 %v1305_v46 }
  0x2d   :  { %869 = vmatprep.subr.bf16.mxu1 %v1308_v47  ;;  %858 = vmatprep.mubr.bf16.mxu0 %v1329_v1 }
  0x2e   :  { %899 = vmatprep.mubr.bf16.mxu1 %v1329_v1 }
  0x2f   :  { %829 = vmatpush1.bf16.msra.mxu0 %v1303_v48 }
  0x30   :  { %870 = vmatpush1.bf16.msra.mxu1 %v1306_v49  ;;  %908 = vmatprep.subr.bf16.mxu0 %v1311_v50 }
  0x31   :  { %949 = vmatprep.subr.bf16.mxu1 %v1314_v51 }
  0x32   :  { %1197 = vmatmul.mubr.msk.bf16.vlgmr.msra.gmra.mrb[20].mxu0 %vm46_vm0, %v1396_v10 }
  0x33   :  { %1198 = vmatmul.mubr.msk.bf16.vlgmr.msra.gmra.mrb[20].mxu1 %vm46_vm0, %v1396_v10  ;;  %909 = vmatpush1.bf16.msra.mxu0 %v1309_v52 }
  0x34   :  { %950 = vmatpush1.bf16.msra.mxu1 %v1312_v53  ;;  %910 = vmatprep.subr.bf16.mxu0 %v1317_v54 }
  0x35   :  { %951 = vmatprep.subr.bf16.mxu1 %v1320_v55  ;;  %940 = vmatprep.mubr.bf16.mxu0 %v1329_v1 }
  0x36   :  { %981 = vmatprep.mubr.bf16.mxu1 %v1329_v1 }
  0x37   :  { %911 = vmatpush1.bf16.msra.mxu0 %v1315_v56 }
  0x38   :  { %952 = vmatpush1.bf16.msra.mxu1 %v1318_v57  ;;  %990 = vmatprep.subr.bf16.mxu0 %v1323_v58 }
  0x39   :  { %1230 = vmatprep.subr.bf16.mxu1 %v1330_v30 }
  0x3a   :  { %1199 = vmatmul.mubr.msk.bf16.vlgmr.msra.gmra.mrb[24].mxu0 %vm46_vm0, %v1396_v10 }
  0x3b   :  { %1200 = vmatmul.mubr.msk.bf16.vlgmr.msra.gmra.mrb[24].mxu1 %vm46_vm0, %v1396_v10  ;;  %991 = vmatpush1.bf16.msra.mxu0 %v1321_v59 }
  0x3c   :  { %1231 = vmatpush3.bf16.msra.mxu1 %v1324_v60  ;;  %992 = vmatprep.subr.bf16.mxu0 %v1327_v61 }
  0x3d   :  { %1232 = vmatprep.subr.bf16.mxu1 %v1330_v30  ;;  %1022 = vmatprep.mubr.bf16.mxu0 %v1329_v1 }
  0x3e   :  { %1234 = vmatprep.mubr.msk.bf16.mxu1 %vm1331_vm1, %v1330_v30 }
  0x3f   :  { %993 = vmatpush1.bf16.msra.mxu0 %v1325_v62 }
  0x40   :  { %1233 = vmatpush3.bf16.msra.mxu1 %v1328_v63 }
  0x42   :  { %1201 = vmatmul.mubr.msk.bf16.vlgmr.msra.gmra.mrb[28].mxu0 %vm46_vm0, %v1396_v10 }
  0x43   :  { %1235 = vmatmul.mubr.msk.bf16.vlgmr.msra.gmra.mrb[28].mxu1 %vm46_vm0, %v1396_v10 }
  0xdd   :  { %v84_v0 = vpop.f32.mrb[0].mxu0 }
  0xde   :  { %v290_v2 = vpop.f32.mrb[0].mxu1  ;;  %91 = vst [vmem:[%s1700_s4] sm:$0xff] %v84_v0  ;;  %v86_v1 = vpop.f32.mrb[1].mxu0 }
  0xdf   :  { %542 = vst [vmem:[%s1701_s5] sm:$0xff] %v290_v2  ;;  %v292_v3 = vpop.f32.mrb[1].mxu1  ;;  %92 = vst [vmem:[%s1700_s4 + $0x8] sm:$0xff] %v86_v1  ;;  %v88_v4 = vpop.f32.mrb[2].mxu0 }
  0xe0   :  { %543 = vst [vmem:[%s1701_s5 + $0x8] sm:$0xff] %v292_v3  ;;  %v294_v5 = vpop.f32.mrb[2].mxu1  ;;  %v89_v6 = vpop.f32.mrb[3].mxu0 }
  0xe1   :  { %v295_v7 = vpop.f32.mrb[3].mxu1 }
  0xe5   :  { %v331_v8 = vpop.f32.mrb[4].mxu0 }
  0xe6   :  { %v372_v9 = vpop.f32.mrb[4].mxu1  ;;  %544 = vst [vmem:[%s1701_s5 + $0x10] sm:$0xff] %v331_v8  ;;  %v333_v10 = vpop.f32.mrb[5].mxu0 }
  0xe7   :  { %546 = vst [vmem:[%s1701_s5 + $0x20] sm:$0xff] %v372_v9  ;;  %v374_v11 = vpop.f32.mrb[5].mxu1  ;;  %545 = vst [vmem:[%s1701_s5 + $0x18] sm:$0xff] %v333_v10  ;;  %v335_v12 = vpop.f32.mrb[6].mxu0 }
  0xe8   :  { %547 = vst [vmem:[%s1701_s5 + $0x28] sm:$0xff] %v374_v11  ;;  %v376_v13 = vpop.f32.mrb[6].mxu1  ;;  %v336_v14 = vpop.f32.mrb[7].mxu0 }
  0xe9   :  { %v377_v15 = vpop.f32.mrb[7].mxu1 }
  0xed   :  { %v413_v16 = vpop.f32.mrb[8].mxu0 }
  0xee   :  { %v454_v17 = vpop.f32.mrb[8].mxu1  ;;  %548 = vst [vmem:[%s1701_s5 + $0x30] sm:$0xff] %v413_v16  ;;  %v415_v18 = vpop.f32.mrb[9].mxu0 }
  0xef   :  { %550 = vst [vmem:[%s1701_s5 + $0x40] sm:$0xff] %v454_v17  ;;  %v456_v19 = vpop.f32.mrb[9].mxu1  ;;  %549 = vst [vmem:[%s1701_s5 + $0x38] sm:$0xff] %v415_v18  ;;  %v417_v20 = vpop.f32.mrb[10].mxu0 }
  0xf0   :  { %551 = vst [vmem:[%s1701_s5 + $0x48] sm:$0xff] %v456_v19  ;;  %v458_v21 = vpop.f32.mrb[10].mxu1  ;;  %v418_v22 = vpop.f32.mrb[11].mxu0 }
  0xf1   :  { %v459_v23 = vpop.f32.mrb[11].mxu1 }
  0xf5   :  { %v495_v24 = vpop.f32.mrb[12].mxu0 }
  0xf6   :  { %v536_v25 = vpop.f32.mrb[12].mxu1  ;;  %552 = vst [vmem:[%s1701_s5 + $0x50] sm:$0xff] %v495_v24  ;;  %v497_v26 = vpop.f32.mrb[13].mxu0 }
  0xf7   :  { %554 = vst [vmem:[%s1701_s5 + $0x60] sm:$0xff] %v536_v25  ;;  %v1228_v27 = vpop.f32.mrb[13].mxu1  ;;  %553 = vst [vmem:[%s1701_s5 + $0x58] sm:$0xff] %v497_v26  ;;  %v499_v28 = vpop.f32.mrb[14].mxu0 }
  0xf8   :  { %v539_v29 = vpop.f32.mrb[14].mxu1  ;;  %v500_v30 = vpop.f32.mrb[15].mxu0 }
  0xf9   :  { %v1229_v31 = vpop.f32.mrb[15].mxu1 }
  0xfd   :  { %v614_v32 = vpop.f32.mrb[16].mxu0 }
  0xfe   :  { %v819_v33 = vpop.f32.mrb[16].mxu1  ;;  %1140 = vst [vmem:[%s1700_s4 + $0x10] sm:$0xff] %v614_v32  ;;  %v616_v34 = vpop.f32.mrb[17].mxu0 }
  0xff   :  { %1203 = vst [vmem:[%s1701_s5 + $0x68] sm:$0xff] %v819_v33  ;;  %v821_v35 = vpop.f32.mrb[17].mxu1  ;;  %1141 = vst [vmem:[%s1700_s4 + $0x18] sm:$0xff] %v616_v34  ;;  %v618_v36 = vpop.f32.mrb[18].mxu0 }
 0x100   :  { %1204 = vst [vmem:[%s1701_s5 + $0x70] sm:$0xff] %v821_v35  ;;  %v823_v37 = vpop.f32.mrb[18].mxu1  ;;  %v619_v38 = vpop.f32.mrb[19].mxu0 }
 0x101   :  { %v824_v39 = vpop.f32.mrb[19].mxu1 }
 0x105   :  { %v860_v40 = vpop.f32.mrb[20].mxu0 }
 0x106   :  { %v901_v41 = vpop.f32.mrb[20].mxu1  ;;  %1205 = vst [vmem:[%s1701_s5 + $0x78] sm:$0xff] %v860_v40  ;;  %v862_v42 = vpop.f32.mrb[21].mxu0 }
 0x107   :  { %1207 = vst [vmem:[%s1701_s5 + $0x88] sm:$0xff] %v901_v41  ;;  %v903_v43 = vpop.f32.mrb[21].mxu1  ;;  %1206 = vst [vmem:[%s1701_s5 + $0x80] sm:$0xff] %v862_v42  ;;  %v864_v44 = vpop.f32.mrb[22].mxu0 }
 0x108   :  { %1208 = vst [vmem:[%s1701_s5 + $0x90] sm:$0xff] %v903_v43  ;;  %v905_v45 = vpop.f32.mrb[22].mxu1  ;;  %v865_v46 = vpop.f32.mrb[23].mxu0 }
 0x109   :  { %v906_v47 = vpop.f32.mrb[23].mxu1 }
 0x10d   :  { %v942_v48 = vpop.f32.mrb[24].mxu0 }
 0x10e   :  { %v983_v49 = vpop.f32.mrb[24].mxu1  ;;  %1209 = vst [vmem:[%s1701_s5 + $0x98] sm:$0xff] %v942_v48  ;;  %v944_v50 = vpop.f32.mrb[25].mxu0 }
 0x10f   :  { %1211 = vst [vmem:[%s1701_s5 + $0xa8] sm:$0xff] %v983_v49  ;;  %v985_v51 = vpop.f32.mrb[25].mxu1  ;;  %1210 = vst [vmem:[%s1701_s5 + $0xa0] sm:$0xff] %v944_v50  ;;  %v946_v52 = vpop.f32.mrb[26].mxu0 }
 0x110   :  { %1212 = vst [vmem:[%s1701_s5 + $0xb0] sm:$0xff] %v985_v51  ;;  %v987_v53 = vpop.f32.mrb[26].mxu1  ;;  %v947_v54 = vpop.f32.mrb[27].mxu0 }
 0x111   :  { %v988_v55 = vpop.f32.mrb[27].mxu1 }
 0x115   :  { %v1024_v56 = vpop.f32.mrb[28].mxu0 }
 0x116   :  { %v1065_v57 = vpop.f32.mrb[28].mxu1  ;;  %1213 = vst [vmem:[%s1701_s5 + $0xb8] sm:$0xff] %v1024_v56  ;;  %v1026_v58 = vpop.f32.mrb[29].mxu0 }
 0x117   :  { %1215 = vst [vmem:[%s1701_s5 + $0xc8] sm:$0xff] %v1065_v57  ;;  %v1236_v59 = vpop.f32.mrb[29].mxu1  ;;  %1214 = vst [vmem:[%s1701_s5 + $0xc0] sm:$0xff] %v1026_v58  ;;  %v1028_v60 = vpop.f32.mrb[30].mxu0 }
 0x118   :  { %v1068_v61 = vpop.f32.mrb[30].mxu1  ;;  %v1029_v62 = vpop.f32.mrb[31].mxu0 }
 0x119   :  { %v1237_v63 = vpop.f32.mrb[31].mxu1 }

</bundles_post_ra>
